<compile_context>
chip_gen: v6e
topology: v6e:2x2x1
jax: 0.10.0
libtpu: 0.0.40
codegen_flags: <defaults>
</compile_context>

<pallas_src>
import functools

import jax
import jax.numpy as jnp
from jax import lax
from jax.experimental import pallas as pl
from jax.experimental.pallas import tpu as pltpu


def _round_up(x, m):
    return (x + m - 1) // m * m


def _default_exp_dtype():
    """bf16 exp on chips with a bf16 EUP (v6e/v7x); f32 otherwise (v5e etc.)."""
    try:
        kind = jax.devices()[0].device_kind.lower()
    except Exception:
        return jnp.float32
    if "v6" in kind or "v7" in kind:
        return jnp.bfloat16
    return jnp.float32


def _lm_target_kernel(x_ref, tgt_ref, seg_ref, w_ref, b_ref, out_ref,
                      m_sc, l_sc, t_sc, *, tv, exp_dtype):
    """Grid = (token_groups, vocab_tiles, token_tiles_in_group).

    The vocab axis (axis 1) is the reduction; the weight tile's block index
    depends only on it, so W stays resident in VMEM across the inner token
    sweep.  Per-token running statistics persist across vocab tiles in VMEM
    scratch indexed by the inner token program_id:
      m_sc[i]: (TM, 1) running row max
      l_sc[i]: (TM, 1) running sum of exp(logit - m)
      t_sc[i]: (TM, 1) running target logit (masked max; init -inf)
    On the last vocab tile, per-token-tile partial sums are written lane-dense:
      out_ref[(8,128)]: lane 0 = masked NLL sum, lane 1 = masked correct sum,
                        lane 2 = number of selected (seg > 0) tokens.
    """
    j = pl.program_id(1)          # vocab tile (reduction)
    i = pl.program_id(2)          # token tile within the group
    nv = pl.num_programs(1)

    @pl.when(j == 0)
    def _():
        shape = m_sc.shape[1:]
        m_sc[i] = jnp.full(shape, -jnp.inf, jnp.float32)
        l_sc[i] = jnp.zeros(shape, jnp.float32)
        t_sc[i] = jnp.full(shape, -jnp.inf, jnp.float32)

    x = x_ref[...]                                     # [TM, H]  bf16
    w = w_ref[...]                                     # [H, TV]  bf16 (resident)
    b = b_ref[...]                                     # [1, TV]  f32 (-1e30 on pad cols)
    logits = jnp.dot(x, w, preferred_element_type=jnp.float32) + b   # [TM, TV] f32

    # --- online logsumexp update ---
    tile_max = jnp.max(logits, axis=-1, keepdims=True)               # [TM, 1]
    m_prev = m_sc[i]
    m_new = jnp.maximum(m_prev, tile_max)
    alpha = jnp.exp(m_prev - m_new)
    p = jnp.exp((logits - m_new).astype(exp_dtype)).astype(jnp.float32)
    l_sc[i] = alpha * l_sc[i] + jnp.sum(p, axis=-1, keepdims=True)
    m_sc[i] = m_new

    # --- running target logit via masked max (no one-hot multiply) ---
    tgt = tgt_ref[...]                                 # [TM, 1] int32
    vocab_ids = j * tv + lax.broadcasted_iota(jnp.int32, logits.shape, 1)
    t_tile = jnp.max(jnp.where(vocab_ids == tgt, logits, -jnp.inf),
                     axis=-1, keepdims=True)
    t_sc[i] = jnp.maximum(t_sc[i], t_tile)

    @pl.when(j == nv - 1)
    def _():
        m = m_sc[i]
        l = l_sc[i]
        t = t_sc[i]
        lse = m + jnp.log(l)
        nll = lse - t                                              # [TM, 1]
        # Prediction is correct iff the target's logit equals the global max.
        # (Ties count as correct; differs from torch.argmax only on exact ties.)
        correct = (t >= m).astype(jnp.float32)
        maskb = seg_ref[...] > 0                                   # [TM, 1] bool
        # jnp.where (not mask*nll) so an out-of-vocab target on a masked row
        # (nll = +inf) cannot poison the sum with 0*inf = NaN.
        loss_sum = jnp.sum(jnp.where(maskb, nll, 0.0))
        correct_sum = jnp.sum(jnp.where(maskb, correct, 0.0))
        count = jnp.sum(maskb.astype(jnp.float32))

        lane = lax.broadcasted_iota(jnp.int32, out_ref.shape, 1)   # (8, 128)
        out_ref[...] = (jnp.where(lane == 0, loss_sum, 0.0)
                        + jnp.where(lane == 1, correct_sum, 0.0)
                        + jnp.where(lane == 2, count, 0.0))


class LmTarget:
    """LM-style target: (loss, correct, denominator) — hot path in Pallas."""

    def __init__(self, hidden_size, vocab_size, key, *,
                 max_tile_m=512, max_tile_v=1024):
        kw, kb = jax.random.split(key)
        self.hidden_size = hidden_size
        self.vocab_size = vocab_size
        self.max_tile_m = max_tile_m
        # Deterministic synthetic parameters (nn.Linear(hidden, vocab) shapes).
        self.w = jax.random.normal(kw, (hidden_size, vocab_size), jnp.float32) * 0.02
        self.b = jax.random.normal(kb, (vocab_size,), jnp.float32) * 0.02

        # Vocab tiling decided once; weight/bias pre-padded + pre-cast to bf16
        # here so there is no per-call extra HBM pass over the H x V weight.
        tv_cap = max_tile_v if hidden_size <= 4096 else min(max_tile_v, 512)
        self.tv = min(tv_cap, _round_up(vocab_size, 128))
        self.v_pad = _round_up(vocab_size, self.tv)
        self.w_pad = jnp.pad(
            self.w, ((0, 0), (0, self.v_pad - vocab_size))).astype(jnp.bfloat16)
        # Padded vocab columns get a hugely negative bias so they never affect
        # the row max / logsumexp / correctness check.
        self.b_pad = jnp.pad(
            self.b, (0, self.v_pad - vocab_size), constant_values=-1e30
        ).reshape(1, self.v_pad).astype(jnp.float32)

    def __call__(self, memory_bank, tgt, seg):
        B, S, H = memory_bank.shape
        assert H == self.hidden_size
        V = self.vocab_size
        N = B * S
        TV, V_pad = self.tv, self.v_pad
        nv = V_pad // TV

        # --- token tiling: multiple of 256 (MXU M) for big N, 16 for tiny N ---
        if N >= 256:
            TM = _round_up(min(self.max_tile_m, _round_up(N, 256)), 256)
        else:
            TM = _round_up(min(self.max_tile_m, _round_up(N, 16)), 16)
        N_pad = _round_up(N, TM)
        nt = N_pad // TM
        # Leading "parallel" token-group axis (G=2 when possible) keeps the
        # grid megacore-shardable on v7x while W is streamed only G times.
        if nt >= 2:
            G = 2
            N_pad = _round_up(N, G * TM)
            nt = N_pad // TM
        else:
            G = 1
        nt_in = nt // G

        # --- host-side padding / casts ---
        # x stays bf16 in HBM because it is the re-streamed operand (nv passes).
        # TODO(synk): allow_input_fusion could fold this cast into the producer.
        x = memory_bank.reshape(N, H)
        x = jnp.pad(x, ((0, N_pad - N), (0, 0))).astype(jnp.bfloat16)
        t = jnp.pad(tgt.reshape(N).astype(jnp.int32), (0, N_pad - N)).reshape(N_pad, 1)
        s = jnp.pad(seg.reshape(N).astype(jnp.int32), (0, N_pad - N)).reshape(N_pad, 1)

        exp_dtype = _default_exp_dtype()

        # --- VMEM budget: actual need with headroom, capped at 3/4 physical ---
        vmem_need = (
            2 * TM * H * 2            # x double-buffer (bf16)
            + 2 * H * TV * 2          # W double-buffer (bf16)
            + 2 * TV * 4              # bias
            + 2 * 2 * TM * 128 * 4    # tgt + seg blocks (lane-padded)
            + 2 * 8 * 128 * 4         # output block
            + 3 * nt_in * TM * 128 * 4  # m/l/t scratch (lane-padded)
            + 6 * TM * TV * 4         # f32 logits / exp / compare temporaries
        )
        try:
            phys_vmem = int(pltpu.get_tpu_info().vmem_capacity_bytes)
        except Exception:
            phys_vmem = 64 * 1024 * 1024   # safe floor (v7x per-core VMEM)
        vmem_limit = int(min(max(2 * vmem_need, 32 * 1024 * 1024),
                             (phys_vmem * 3) // 4))

        cost = pl.CostEstimate(
            flops=2 * N_pad * H * V_pad,
            transcendentals=N_pad * V_pad + 4 * N_pad * nv,
            bytes_accessed=int(nv * N_pad * (H * 2 + 8)        # x, tgt, seg per vocab tile
                               + G * (H * V_pad * 2 + V_pad * 4)  # W + bias per group
                               + nv * nt * 8 * 128 * 4),          # output writebacks
        )

        tok_map = lambda g, j, i: (g * nt_in + i, 0)
        voc_map = lambda g, j, i: (0, j)

        out = pl.pallas_call(
            functools.partial(_lm_target_kernel, tv=TV, exp_dtype=exp_dtype),
            out_shape=jax.ShapeDtypeStruct((nt * 8, 128), jnp.float32),
            grid_spec=pltpu.PrefetchScalarGridSpec(
                num_scalar_prefetch=0,
                grid=(G, nv, nt_in),
                in_specs=[
                    pl.BlockSpec((TM, H), tok_map),   # activations (bf16)
                    pl.BlockSpec((TM, 1), tok_map),   # targets
                    pl.BlockSpec((TM, 1), tok_map),   # segment mask
                    pl.BlockSpec((H, TV), voc_map),   # weight tile (resident over i)
                    pl.BlockSpec((1, TV), voc_map),   # bias tile
                ],
                out_specs=pl.BlockSpec((8, 128), tok_map),
                scratch_shapes=[
                    pltpu.VMEM((nt_in, TM, 1), jnp.float32),   # running max
                    pltpu.VMEM((nt_in, TM, 1), jnp.float32),   # running sum-exp
                    pltpu.VMEM((nt_in, TM, 1), jnp.float32),   # running target logit
                ],
            ),
            compiler_params=pltpu.CompilerParams(
                dimension_semantics=("parallel", "arbitrary", "arbitrary"),
                vmem_limit_bytes=vmem_limit,
            ),
            cost_estimate=cost,
        )(x, t, s, self.w_pad, self.b_pad)

        # Each token tile wrote sublane 0 of its (8, 128) block; reduce in JAX.
        partials = out.reshape(nt, 8, 128)[:, 0, :]
        totals = jnp.sum(partials, axis=0)
        loss_sum, correct, n_sel = totals[0], totals[1], totals[2]

        # NOTE: denominator keeps the +1e-6 epsilon guard (matches reference
        # below; the raw selected-token count is n_sel = denominator - 1e-6).
        denominator = n_sel + 1e-6
        loss = loss_sum / denominator
        return loss, correct, denominator


class Target:
    """Faithful port of tencentpretrain.targets.target.Target (dispatch only)."""

    def __init__(self):
        self.target_name_list = []
        self.loss_info = {}

    def update(self, target, target_name):
        setattr(self, target_name, target)
        self.target_name_list.append(target_name)

    def forward(self, memory_bank, tgt, seg):
        self.loss_info = {}
        for i, target_name in enumerate(self.target_name_list):
            target = getattr(self, target_name)
            if len(self.target_name_list) > 1:
                self.loss_info[self.target_name_list[i]] = target(
                    memory_bank, tgt[self.target_name_list[i]], seg)
            else:
                self.loss_info = target(memory_bank, tgt, seg)
        return self.loss_info

    __call__ = forward


def _reference(memory_bank, tgt, seg, w, b):
    """Pure-JAX reference with the same bf16 matmul inputs."""
    H = memory_bank.shape[-1]
    x = memory_bank.reshape(-1, H).astype(jnp.bfloat16).astype(jnp.float32)
    wf = w.astype(jnp.bfloat16).astype(jnp.float32)
    logits = x @ wf + b
    logp = jax.nn.log_softmax(logits, axis=-1)
    t = tgt.reshape(-1)
    s = seg.reshape(-1)
    mask = (s > 0).astype(jnp.float32)
    nll = -jnp.take_along_axis(logp, t[:, None], axis=-1)[:, 0]
    n_sel = jnp.sum(mask)
    denom = n_sel + 1e-6
    loss = jnp.sum(mask * nll) / denom
    correct = jnp.sum(mask * (jnp.argmax(logits, axis=-1) == t).astype(jnp.float32))
    return loss, correct, denom


if __name__ == "__main__":
    B, S, H, V = 2, 16, 32, 384
    key = jax.random.PRNGKey(0)
    k_mb, k_tgt, k_seg, k_param = jax.random.split(key, 4)

    memory_bank = jax.random.normal(k_mb, (B, S, H), jnp.float32)
    tgt = jax.random.randint(k_tgt, (B, S), 0, V, jnp.int32)
    # seg: mostly 1 with a few 0 (padding) positions.
    seg = (jax.random.uniform(k_seg, (B, S)) > 0.2).astype(jnp.int32)

    # Small tile caps so the test exercises: multiple vocab tiles (online
    # logsumexp), multiple token tiles, and the G=2 megacore-ready grid split.
    lm = LmTarget(H, V, k_param, max_tile_m=16, max_tile_v=128)
    target = Target()
    target.update(lm, "lm")

    loss_info = target(memory_bank, tgt, seg)
    loss, correct, denominator = jax.block_until_ready(loss_info)

    ref_loss, ref_correct, ref_denom = _reference(memory_bank, tgt, seg, lm.w, lm.b)

    assert jnp.isfinite(loss)
    assert float(denominator) > 0.0
    assert jnp.allclose(loss, ref_loss, rtol=2e-2, atol=2e-2)
    assert abs(float(correct) - float(ref_correct)) < 0.5
    assert jnp.allclose(denominator, ref_denom, rtol=1e-5, atol=1e-3)
    print("KERNEL_OK")
</pallas_src>

<mosaic_0001>
module attributes {stable_mosaic.version = 11 : i64} {
  func.func @_lm_target_kernel(%arg0: i32, %arg1: i32, %arg2: i32, %arg3: memref<16x32xbf16, #tpu.memory_space<vmem>>, %arg4: memref<16x1xi32, #tpu.memory_space<vmem>>, %arg5: memref<16x1xi32, #tpu.memory_space<vmem>>, %arg6: memref<32x128xbf16, #tpu.memory_space<vmem>>, %arg7: memref<1x128xf32, #tpu.memory_space<vmem>>, %arg8: memref<8x128xf32, #tpu.memory_space<vmem>>, %arg9: memref<1x16x1xf32, #tpu.memory_space<vmem>>, %arg10: memref<1x16x1xf32, #tpu.memory_space<vmem>>, %arg11: memref<1x16x1xf32, #tpu.memory_space<vmem>>) attributes {dimension_semantics = [#tpu.dimension_semantics<parallel>, #tpu.dimension_semantics<arbitrary>, #tpu.dimension_semantics<arbitrary>], iteration_bounds = array<i64: 2, 3, 1>, scalar_prefetch = 0 : i64, scratch_operands = 3 : i64, tpu.core_type = #tpu.core_type<tc>, window_params = [{transform_indices = @transform_0, window_bounds = array<i64: 16, 32>}, {transform_indices = @transform_1, window_bounds = array<i64: 16, 1>}, {transform_indices = @transform_2, window_bounds = array<i64: 16, 1>}, {transform_indices = @transform_3, window_bounds = array<i64: 32, 128>}, {transform_indices = @transform_4, window_bounds = array<i64: 1, 128>}, {transform_indices = @transform_5, window_bounds = array<i64: 8, 128>}]} {
    %c0_i32 = arith.constant 0 : i32
    %0 = arith.cmpi eq, %arg1, %c0_i32 : i32
    %1 = arith.extui %0 : i1 to i32
    %c0_i32_0 = arith.constant 0 : i32
    %2 = arith.cmpi ne, %1, %c0_i32_0 : i32
    scf.if %2 {
      %cst_25 = arith.constant 0xFF800000 : f32
      %57 = vector.broadcast %cst_25 : f32 to vector<16x1xf32>
      %58 = arith.index_cast %arg2 : i32 to index
      %c0_26 = arith.constant 0 : index
      %c0_27 = arith.constant 0 : index
      %59 = vector.load %arg9[%58, %c0_26, %c0_27] : memref<1x16x1xf32, #tpu.memory_space<vmem>>, vector<1x16x1xf32>
      %60 = vector.shape_cast %59 : vector<1x16x1xf32> to vector<16x1xf32>
      %61 = vector.shape_cast %57 : vector<16x1xf32> to vector<1x16x1xf32>
      tpu.vector_store %arg9[%58, %c0_26, %c0_27], %61 {strides = array<i32>} : memref<1x16x1xf32, #tpu.memory_space<vmem>>, vector<1x16x1xf32>,
      %cst_28 = arith.constant 0.000000e+00 : f32
      %62 = vector.broadcast %cst_28 : f32 to vector<16x1xf32>
      %63 = arith.index_cast %arg2 : i32 to index
      %c0_29 = arith.constant 0 : index
      %c0_30 = arith.constant 0 : index
      %64 = vector.load %arg10[%63, %c0_29, %c0_30] : memref<1x16x1xf32, #tpu.memory_space<vmem>>, vector<1x16x1xf32>
      %65 = vector.shape_cast %64 : vector<1x16x1xf32> to vector<16x1xf32>
      %66 = vector.shape_cast %62 : vector<16x1xf32> to vector<1x16x1xf32>
      tpu.vector_store %arg10[%63, %c0_29, %c0_30], %66 {strides = array<i32>} : memref<1x16x1xf32, #tpu.memory_space<vmem>>, vector<1x16x1xf32>,
      %cst_31 = arith.constant 0xFF800000 : f32
      %67 = vector.broadcast %cst_31 : f32 to vector<16x1xf32>
      %68 = arith.index_cast %arg2 : i32 to index
      %c0_32 = arith.constant 0 : index
      %c0_33 = arith.constant 0 : index
      %69 = vector.load %arg11[%68, %c0_32, %c0_33] : memref<1x16x1xf32, #tpu.memory_space<vmem>>, vector<1x16x1xf32>
      %70 = vector.shape_cast %69 : vector<1x16x1xf32> to vector<16x1xf32>
      %71 = vector.shape_cast %67 : vector<16x1xf32> to vector<1x16x1xf32>
      tpu.vector_store %arg11[%68, %c0_32, %c0_33], %71 {strides = array<i32>} : memref<1x16x1xf32, #tpu.memory_space<vmem>>, vector<1x16x1xf32>,
    } else {
    }
    %c0 = arith.constant 0 : index
    %c0_1 = arith.constant 0 : index
    %3 = vector.load %arg3[%c0, %c0_1] : memref<16x32xbf16, #tpu.memory_space<vmem>>, vector<16x32xbf16>
    %c0_2 = arith.constant 0 : index
    %c0_3 = arith.constant 0 : index
    %4 = vector.load %arg6[%c0_2, %c0_3] : memref<32x128xbf16, #tpu.memory_space<vmem>>, vector<32x128xbf16>
    %c0_4 = arith.constant 0 : index
    %c0_5 = arith.constant 0 : index
    %5 = vector.load %arg7[%c0_4, %c0_5] : memref<1x128xf32, #tpu.memory_space<vmem>>, vector<1x128xf32>
    %cst = arith.constant dense<0.000000e+00> : vector<16x128xf32>
    %6 = tpu.matmul %3, %4, %cst {dimension_numbers = #tpu.dot_dimension_numbers<[1], [0], [0], [1], [0, 0, 1, 1], [], []>} : vector<16x32xbf16>, vector<32x128xbf16>, vector<16x128xf32> -> vector<16x128xf32>
    %7 = vector.broadcast %5 : vector<1x128xf32> to vector<16x128xf32>
    %8 = arith.addf %6, %7 : vector<16x128xf32>
    %cst_6 = arith.constant dense<0xFF800000> : vector<16xf32>
    %9 = vector.multi_reduction <maximumf>, %8, %cst_6 [1] : vector<16x128xf32> to vector<16xf32>
    %10 = vector.shape_cast %9 : vector<16xf32> to vector<16x1xf32>
    %11 = arith.index_cast %arg2 : i32 to index
    %c0_7 = arith.constant 0 : index
    %c0_8 = arith.constant 0 : index
    %12 = vector.load %arg9[%11, %c0_7, %c0_8] : memref<1x16x1xf32, #tpu.memory_space<vmem>>, vector<1x16x1xf32>
    %13 = vector.shape_cast %12 : vector<1x16x1xf32> to vector<16x1xf32>
    %14 = arith.maximumf %13, %10 : vector<16x1xf32>
    %15 = arith.subf %13, %14 : vector<16x1xf32>
    %16 = math.exp %15 : vector<16x1xf32>
    %17 = vector.broadcast %14 : vector<16x1xf32> to vector<16x128xf32>
    %18 = arith.subf %8, %17 : vector<16x128xf32>
    %19 = math.exp %18 : vector<16x128xf32>
    %20 = arith.index_cast %arg2 : i32 to index
    %c0_9 = arith.constant 0 : index
    %c0_10 = arith.constant 0 : index
    %21 = vector.load %arg10[%20, %c0_9, %c0_10] : memref<1x16x1xf32, #tpu.memory_space<vmem>>, vector<1x16x1xf32>
    %22 = vector.shape_cast %21 : vector<1x16x1xf32> to vector<16x1xf32>
    %23 = arith.mulf %16, %22 : vector<16x1xf32>
    %cst_11 = arith.constant dense<0.000000e+00> : vector<16xf32>
    %24 = vector.multi_reduction <add>, %19, %cst_11 [1] : vector<16x128xf32> to vector<16xf32>
    %25 = vector.shape_cast %24 : vector<16xf32> to vector<16x1xf32>
    %26 = arith.addf %23, %25 : vector<16x1xf32>
    %27 = arith.index_cast %arg2 : i32 to index
    %c0_12 = arith.constant 0 : index
    %c0_13 = arith.constant 0 : index
    %28 = vector.load %arg10[%27, %c0_12, %c0_13] : memref<1x16x1xf32, #tpu.memory_space<vmem>>, vector<1x16x1xf32>
    %29 = vector.shape_cast %28 : vector<1x16x1xf32> to vector<16x1xf32>
    %30 = vector.shape_cast %26 : vector<16x1xf32> to vector<1x16x1xf32>
    tpu.vector_store %arg10[%27, %c0_12, %c0_13], %30 {strides = array<i32>} : memref<1x16x1xf32, #tpu.memory_space<vmem>>, vector<1x16x1xf32>,
    %31 = arith.index_cast %arg2 : i32 to index
    %c0_14 = arith.constant 0 : index
    %c0_15 = arith.constant 0 : index
    %32 = vector.load %arg9[%31, %c0_14, %c0_15] : memref<1x16x1xf32, #tpu.memory_space<vmem>>, vector<1x16x1xf32>
    %33 = vector.shape_cast %32 : vector<1x16x1xf32> to vector<16x1xf32>
    %34 = vector.shape_cast %14 : vector<16x1xf32> to vector<1x16x1xf32>
    tpu.vector_store %arg9[%31, %c0_14, %c0_15], %34 {strides = array<i32>} : memref<1x16x1xf32, #tpu.memory_space<vmem>>, vector<1x16x1xf32>,
    %c0_16 = arith.constant 0 : index
    %c0_17 = arith.constant 0 : index
    %35 = vector.load %arg4[%c0_16, %c0_17] : memref<16x1xi32, #tpu.memory_space<vmem>>, vector<16x1xi32>
    %c128_i32 = arith.constant 128 : i32
    %36 = arith.muli %arg1, %c128_i32 : i32
    %37 = tpu.iota {dimensions = array<i32: 1>} : vector<16x128xi32>
    %38 = vector.broadcast %36 : i32 to vector<16x128xi32>
    %39 = arith.addi %38, %37 : vector<16x128xi32>
    %40 = vector.broadcast %35 : vector<16x1xi32> to vector<16x128xi32>
    %41 = arith.cmpi eq, %39, %40 : vector<16x128xi32>
    %cst_18 = arith.constant 0xFF800000 : f32
    %42 = vector.broadcast %cst_18 : f32 to vector<16x128xf32>
    %43 = arith.select %41, %8, %42 : vector<16x128xi1>, vector<16x128xf32>
    %cst_19 = arith.constant dense<0xFF800000> : vector<16xf32>
    %44 = vector.multi_reduction <maximumf>, %43, %cst_19 [1] : vector<16x128xf32> to vector<16xf32>
    %45 = vector.shape_cast %44 : vector<16xf32> to vector<16x1xf32>
    %46 = arith.index_cast %arg2 : i32 to index
    %c0_20 = arith.constant 0 : index
    %c0_21 = arith.constant 0 : index
    %47 = vector.load %arg11[%46, %c0_20, %c0_21] : memref<1x16x1xf32, #tpu.memory_space<vmem>>, vector<1x16x1xf32>
    %48 = vector.shape_cast %47 : vector<1x16x1xf32> to vector<16x1xf32>
    %49 = arith.maximumf %48, %45 : vector<16x1xf32>
    %50 = arith.index_cast %arg2 : i32 to index
    %c0_22 = arith.constant 0 : index
    %c0_23 = arith.constant 0 : index
    %51 = vector.load %arg11[%50, %c0_22, %c0_23] : memref<1x16x1xf32, #tpu.memory_space<vmem>>, vector<1x16x1xf32>
    %52 = vector.shape_cast %51 : vector<1x16x1xf32> to vector<16x1xf32>
    %53 = vector.shape_cast %49 : vector<16x1xf32> to vector<1x16x1xf32>
    tpu.vector_store %arg11[%50, %c0_22, %c0_23], %53 {strides = array<i32>} : memref<1x16x1xf32, #tpu.memory_space<vmem>>, vector<1x16x1xf32>,
    %c2_i32 = arith.constant 2 : i32
    %54 = arith.cmpi eq, %arg1, %c2_i32 : i32
    %55 = arith.extui %54 : i1 to i32
    %c0_i32_24 = arith.constant 0 : i32
    %56 = arith.cmpi ne, %55, %c0_i32_24 : i32
    scf.if %56 {
      %57 = arith.index_cast %arg2 : i32 to index
      %c0_25 = arith.constant 0 : index
      %c0_26 = arith.constant 0 : index
      %58 = vector.load %arg9[%57, %c0_25, %c0_26] : memref<1x16x1xf32, #tpu.memory_space<vmem>>, vector<1x16x1xf32>
      %59 = vector.shape_cast %58 : vector<1x16x1xf32> to vector<16x1xf32>
      %60 = arith.index_cast %arg2 : i32 to index
      %c0_27 = arith.constant 0 : index
      %c0_28 = arith.constant 0 : index
      %61 = vector.load %arg10[%60, %c0_27, %c0_28] : memref<1x16x1xf32, #tpu.memory_space<vmem>>, vector<1x16x1xf32>
      %62 = vector.shape_cast %61 : vector<1x16x1xf32> to vector<16x1xf32>
      %63 = arith.index_cast %arg2 : i32 to index
      %c0_29 = arith.constant 0 : index
      %c0_30 = arith.constant 0 : index
      %64 = vector.load %arg11[%63, %c0_29, %c0_30] : memref<1x16x1xf32, #tpu.memory_space<vmem>>, vector<1x16x1xf32>
      %65 = vector.shape_cast %64 : vector<1x16x1xf32> to vector<16x1xf32>
      %66 = math.log %62 : vector<16x1xf32>
      %67 = arith.addf %59, %66 : vector<16x1xf32>
      %68 = arith.subf %67, %65 : vector<16x1xf32>
      %69 = arith.cmpf oge, %65, %59 : vector<16x1xf32>
      %70 = arith.extui %69 : vector<16x1xi1> to vector<16x1xi32>
      %71 = arith.sitofp %70 : vector<16x1xi32> to vector<16x1xf32>
      %c0_31 = arith.constant 0 : index
      %c0_32 = arith.constant 0 : index
      %72 = vector.load %arg5[%c0_31, %c0_32] : memref<16x1xi32, #tpu.memory_space<vmem>>, vector<16x1xi32>
      %c0_i32_33 = arith.constant 0 : i32
      %73 = vector.broadcast %c0_i32_33 : i32 to vector<16x1xi32>
      %74 = arith.cmpi sgt, %72, %73 : vector<16x1xi32>
      %cst_34 = arith.constant 0.000000e+00 : f32
      %75 = vector.broadcast %cst_34 : f32 to vector<16x1xf32>
      %76 = arith.select %74, %68, %75 : vector<16x1xi1>, vector<16x1xf32>
      %77 = vector.shape_cast %76 : vector<16x1xf32> to vector<1x16x1xf32>
      %cst_35 = arith.constant dense<0.000000e+00> : vector<1xf32>
      %78 = vector.multi_reduction <add>, %77, %cst_35 [1, 2] : vector<1x16x1xf32> to vector<1xf32>
      %79 = vector.shape_cast %78 : vector<1xf32> to vector<1x1x1xf32>
      %80 = vector.extract %79[0, 0, 0] : f32 from vector<1x1x1xf32>
      %cst_36 = arith.constant 0.000000e+00 : f32
      %81 = vector.broadcast %cst_36 : f32 to vector<16x1xf32>
      %82 = arith.select %74, %71, %81 : vector<16x1xi1>, vector<16x1xf32>
      %83 = vector.shape_cast %82 : vector<16x1xf32> to vector<1x16x1xf32>
      %cst_37 = arith.constant dense<0.000000e+00> : vector<1xf32>
      %84 = vector.multi_reduction <add>, %83, %cst_37 [1, 2] : vector<1x16x1xf32> to vector<1xf32>
      %85 = vector.shape_cast %84 : vector<1xf32> to vector<1x1x1xf32>
      %86 = vector.extract %85[0, 0, 0] : f32 from vector<1x1x1xf32>
      %87 = arith.extui %74 : vector<16x1xi1> to vector<16x1xi32>
      %88 = arith.sitofp %87 : vector<16x1xi32> to vector<16x1xf32>
      %89 = vector.shape_cast %88 : vector<16x1xf32> to vector<1x16x1xf32>
      %cst_38 = arith.constant dense<0.000000e+00> : vector<1xf32>
      %90 = vector.multi_reduction <add>, %89, %cst_38 [1, 2] : vector<1x16x1xf32> to vector<1xf32>
      %91 = vector.shape_cast %90 : vector<1xf32> to vector<1x1x1xf32>
      %92 = vector.extract %91[0, 0, 0] : f32 from vector<1x1x1xf32>
      %93 = tpu.iota {dimensions = array<i32: 1>} : vector<8x128xi32>
      %c0_i32_39 = arith.constant 0 : i32
      %94 = vector.broadcast %c0_i32_39 : i32 to vector<8x128xi32>
      %95 = arith.cmpi eq, %93, %94 : vector<8x128xi32>
      %cst_40 = arith.constant 0.000000e+00 : f32
      %96 = vector.broadcast %80 : f32 to vector<8x128xf32>
      %97 = vector.broadcast %cst_40 : f32 to vector<8x128xf32>
      %98 = arith.select %95, %96, %97 : vector<8x128xi1>, vector<8x128xf32>
      %c1_i32 = arith.constant 1 : i32
      %99 = vector.broadcast %c1_i32 : i32 to vector<8x128xi32>
      %100 = arith.cmpi eq, %93, %99 : vector<8x128xi32>
      %cst_41 = arith.constant 0.000000e+00 : f32
      %101 = vector.broadcast %86 : f32 to vector<8x128xf32>
      %102 = vector.broadcast %cst_41 : f32 to vector<8x128xf32>
      %103 = arith.select %100, %101, %102 : vector<8x128xi1>, vector<8x128xf32>
      %104 = arith.addf %98, %103 : vector<8x128xf32>
      %c2_i32_42 = arith.constant 2 : i32
      %105 = vector.broadcast %c2_i32_42 : i32 to vector<8x128xi32>
      %106 = arith.cmpi eq, %93, %105 : vector<8x128xi32>
      %cst_43 = arith.constant 0.000000e+00 : f32
      %107 = vector.broadcast %92 : f32 to vector<8x128xf32>
      %108 = vector.broadcast %cst_43 : f32 to vector<8x128xf32>
      %109 = arith.select %106, %107, %108 : vector<8x128xi1>, vector<8x128xf32>
      %110 = arith.addf %104, %109 : vector<8x128xf32>
      %c0_44 = arith.constant 0 : index
      %c0_45 = arith.constant 0 : index
      %111 = vector.load %arg8[%c0_44, %c0_45] : memref<8x128xf32, #tpu.memory_space<vmem>>, vector<8x128xf32>
      tpu.vector_store %arg8[%c0_44, %c0_45], %110 {strides = array<i32>} : memref<8x128xf32, #tpu.memory_space<vmem>>, vector<8x128xf32>,
    } else {
    }
    return
  }
  func.func @transform_0(%arg0: i32, %arg1: i32, %arg2: i32) -> (i32, i32) {
    %c1_i32 = arith.constant 1 : i32
    %0 = arith.muli %arg0, %c1_i32 : i32
    %1 = arith.addi %0, %arg2 : i32
    %c0_i32 = arith.constant 0 : i32
    %c0_i32_0 = arith.constant 0 : i32
    return %1, %c0_i32 : i32, i32
  }
  func.func @transform_1(%arg0: i32, %arg1: i32, %arg2: i32) -> (i32, i32) {
    %c1_i32 = arith.constant 1 : i32
    %0 = arith.muli %arg0, %c1_i32 : i32
    %1 = arith.addi %0, %arg2 : i32
    %c0_i32 = arith.constant 0 : i32
    %c0_i32_0 = arith.constant 0 : i32
    return %1, %c0_i32 : i32, i32
  }
  func.func @transform_2(%arg0: i32, %arg1: i32, %arg2: i32) -> (i32, i32) {
    %c1_i32 = arith.constant 1 : i32
    %0 = arith.muli %arg0, %c1_i32 : i32
    %1 = arith.addi %0, %arg2 : i32
    %c0_i32 = arith.constant 0 : i32
    %c0_i32_0 = arith.constant 0 : i32
    return %1, %c0_i32 : i32, i32
  }
  func.func @transform_3(%arg0: i32, %arg1: i32, %arg2: i32) -> (i32, i32) {
    %c0_i32 = arith.constant 0 : i32
    %c0_i32_0 = arith.constant 0 : i32
    return %c0_i32, %arg1 : i32, i32
  }
  func.func @transform_4(%arg0: i32, %arg1: i32, %arg2: i32) -> (i32, i32) {
    %c0_i32 = arith.constant 0 : i32
    %c0_i32_0 = arith.constant 0 : i32
    return %c0_i32, %arg1 : i32, i32
  }
  func.func @transform_5(%arg0: i32, %arg1: i32, %arg2: i32) -> (i32, i32) {
    %c1_i32 = arith.constant 1 : i32
    %0 = arith.muli %arg0, %c1_i32 : i32
    %1 = arith.addi %0, %arg2 : i32
    %c0_i32 = arith.constant 0 : i32
    %c0_i32_0 = arith.constant 0 : i32
    return %1, %c0_i32 : i32, i32
  }
}

</mosaic_0001>

<bundles_post_ra>
// kernel: tpu_custom_call.1
= control target key start
LH: loop header
LB: loop body
LE: loop exit
PB: predicated region body
PF: predicated region fallthrough
CT: control target
= control target key end

     0   :  { %s1333_s0 = inlined_call_operand.vmem [shape: bf16[32,32], index: 0, kind: input, shape index: {}]   ;;  %s1334_s1 = inlined_call_operand.vmem [shape: s32[32,1], index: 1, kind: input, shape index: {}]   ;;  %s1335_s2 = inlined_call_operand.vmem [shape: s32[32,1], index: 2, kind: input, shape index: {}]   ;;  %s1336_s3 = inlined_call_operand.vmem [shape: bf16[32,384], index: 3, kind: input, shape index: {}]   ;;  %s1337_s4 = inlined_call_operand.vmem [shape: f32[1,384], index: 4, kind: input, shape index: {}]   ;;  %s1338_s5 = inlined_call_operand.hbm [shape: f32[16,128], index: 5, kind: output, shape index: {}]  }
   0x1   :  { %1347 = sst [smem:[#allocation18_spill]] %s1336_s3 }
   0x2   :  { %10 = vsyncpa [#allocation7], 0 }
   0x3   :  { %12 = vsyncpa [#allocation7 + $0x1], 0  ;;  %s1109_s18 = smov 0   ;;  %s1111_s19 = smov 0  }
   0x4   :  { %s1113_s20 = smov 0   ;;  %s1115_s21 = smov 0  }
   0x5   :  { %s1117_s22 = smov 0   ;;  %s1119_s23 = smov 0  }
   0x6   :  { %s1121_s24 = smov 0   ;;  %s1123_s25 = smov 0  }
   0x7   :  { %s1125_s26 = smov 0   ;;  %s1127_s27 = smov 0  }
   0x8 LB: > { %1348 = sst [smem:[#allocation9_spill]] %s1042_s20  ;;  %s804_s28 = sadd.s32 4294967295, %s1070_s27   ;;  %s1070_s27 = sphi %s1127_s27, %s18_s27   ;;  %s1066_s26 = sphi %s1125_s26, %s1370_s26   ;;  %s1062_s25 = sphi %s1123_s25, %s1373_s25   ;;  %s1058_s24 = sphi %s1121_s24, %s1368_s24   ;;  %s1054_s23 = sphi %s1119_s23, %s1367_s23   ;;  %s1050_s22 = sphi %s1117_s22, %s1366_s22   ;;  %s1046_s21 = sphi %s1115_s21, %s1365_s21   ;;  %s1042_s20 = sphi %s1113_s20, %s1364_s20   ;;  %s1038_s19 = sphi %s1111_s19, %s1372_s19   ;;  %s1034_s18 = sphi %s1109_s18, %s1371_s18  }
   0x9   : > { %1349 = sst [smem:[#allocation10_spill]] %s1050_s22  ;;  %s805_s29 = sadd.s32 4294967294, %s1070_s27  }
   0xa   : > { %1350 = sst [smem:[#allocation11_spill]] %s1062_s25  ;;  %s33_s30 = sadd.s32 1, %s1062_s25 }
   0xb   : > { %1351 = sst [smem:[#allocation12_spill]] %s1066_s26  ;;  %s37_s6 = sadd.s32 1, %s1066_s26 }
   0xc   : > { %p35_p0 = scmp.ge.s32.totalorder %s33_s30, 3  ;;  %s128_s7 = sadd.s32 1, %s1050_s22 }
   0xd   : > { %p135_p1 = scmp.ne.s32.totalorder %s1050_s22, %s1046_s21  ;;  %p136_p2 = scmp.eq.s32.totalorder %s1070_s27, 0 }
   0xe   : > { %s1375_s30 = smov (%p35_p0, %s33_s30), 0  ;;  %s1377_s6 = smov (!%p35_p0, %s37_s6), %s1066_s26 }
   0xf   : > { %1352 = sst [smem:[#allocation13_spill]] %s1375_s30  ;;  %s125_s8 = ssub.s32 %s1062_s25, %s1375_s30 }
  0x10   : > { %p1172_p3 = por %p136_p2, %p135_p1  ;;  %p39_p4 = scmp.ge.s32.totalorder %s1377_s6, 2 }
  0x11   : > { %p126_p5 = scmp.eq.s32.totalorder %s125_s8, 0  ;;  %s182_s10 = sadd.s32 1, %s1042_s20 }
  0x12   : > { %p192_p6 = scmp.ne.s32.totalorder %s1042_s20, %s1038_s19  ;;  %s1379_s6 = smov (%p39_p4, %s1377_s6), 0 }
  0x13   : > { %1354 = sst [smem:[#allocation14_spill]] %s1379_s6  ;;  %s179_s12 = ssub.s32 %s1066_s26, %s1379_s6 }
  0x14   : > { %s1182_s11 = scalar_select %p126_p5, %s1050_s22, %s128_s7  }
  0x15   : > { %p193_p7 = scmp.eq.s32.totalorder %s804_s28, 5  ;;  %p180_p8 = scmp.eq.s32.totalorder %s179_s12, 0 }
  0x16   : > { %1355 = sst [smem:[#allocation15_spill]] %s1182_s11  ;;  %p198_p9 = scmp.ne.s32.totalorder %s1038_s19, %s1034_s18 }
  0x17   : > { %p1188_p10 = por %p193_p7, %p192_p6  ;;  %p199_p11 = scmp.eq.s32.totalorder %s805_s29, 5 }
  0x18   : > { %s1193_s14 = scalar_select %p180_p8, %s1042_s20, %s182_s10  }
  0x19   : > { %p1195_p12 = por %p199_p11, %p198_p9  ;;  %p807_p13 = scmp.ge.s32.totalorder %s1070_s27, 6 }
  0x1a   : > { %1357 = sst [smem:[#allocation16_spill]] %s1193_s14 }
  0x1b   : > { %s1358_s15 = scalar_select %p1195_p12, 1, 0 }
  0x1c   : > { %215 = sbr.rel (%p807_p13) target bundleno = 45 (0x2d), region = 16 }
  0x1d   : > { %1359 = sst [smem:[#allocation17_spill]] %s1358_s15 }
  0x21   : > { %251 = sbr.rel (!%p1172_p3) target bundleno = 45 (0x2d), region = 32  ;;  %s253_s16 = sand.u32 (%p1172_p3), 1, %s1050_s22  }
  0x22   : > { %s809_s17 = sshll.u32 (%p1172_p3), %s1062_s25, 2  ;;  %s808_s28 = sshll.u32 (%p1172_p3), %s253_s16, 4 }
  0x23   : > { %s1360_s3 = sld [smem:[#allocation18_spill]] (%p1172_p3)  ;;  %s255_s10 = scalar_lea.vmem (%p1172_p3), [#allocation5], %s808_s28 }
  0x29   : > { %s257_s29 = scalar_lea.vmem %s1360_s3, %s809_s17 }
  0x2a   : > { %v274_v0 = vld [vmem:[%s257_s29] sm:$0xf]  ;;  %v276_v1 = vld [vmem:[%s257_s29 + $0xc] sm:$0xf]  ;;  %v278_v2 = vld [vmem:[%s257_s29 + $0x18] sm:$0xf] }
  0x2b   : > { %275 = vst [vmem:[%s255_s10] sm:$0xf] %v274_v0  ;;  %277 = vst [vmem:[%s255_s10 + $0x4] sm:$0xf] %v276_v1  ;;  %v280_v3 = vld [vmem:[%s257_s29 + $0x24] sm:$0xf] }
  0x2c   : > { %279 = vst [vmem:[%s255_s10 + $0x8] sm:$0xf] %v278_v2  ;;  %281 = vst [vmem:[%s255_s10 + $0xc] sm:$0xf] %v280_v3 }
  0x2d PF: > { %p810_p0 = scmp.ge.s32.totalorder %s1070_s27, 1  ;;  %p318_p1 = scmp.lt.s32.totalorder %s1070_s27, 7 }
  0x2f   : > { %p319_p2 = pnand %p810_p0, %p318_p1 }
  0x30   : > { %s325_s9 = sand.u32 (!%p319_p2), 1, %s1046_s21   ;;  %s1341_s12 = sand.u32 (!%p319_p2), 1, %s1038_s19  }
  0x31   : > { %322 = sbr.rel (%p319_p2) target bundleno = 961 (0x3c1), region = 77  ;;  %s1211_s16 = sshll.u32 (!%p319_p2), %s325_s9, 4 }
  0x32   : > { %s1215_s17 = sshll.u32 (!%p319_p2), %s1341_s12, 3  ;;  %s813_s28 = sshll.u32 (!%p319_p2), %s1058_s24, 1 }
  0x33   : > { %p397_p3 = scmp.lt.s32.totalorder (!%p319_p2), %s1054_s23, 2  ;;  %p375_p4 = scmp.lt.s32.totalorder (!%p319_p2), %s813_s28, 3 }
  0x34   : > { %s327_s20 = scalar_lea.vmem (!%p319_p2), [#allocation5], %s1211_s16  ;;  %s372_s15 = scalar_lea.vmem (!%p319_p2), [#allocation6], %s1215_s17 }
  0x35   : > { %p819_p5 = scmp.ne.s32.totalorder (!%p319_p2), %s1054_s23, 0 }
  0x36   : > { %s1220_s7 = scalar_select %p397_p3, %s1054_s23, 2 }
  0x37   : > { %s1381_s28 = smov (!%p375_p4, %s813_s28), 3  ;;  %405 = sbr.rel (%p819_p5) target bundleno = 64 (0x40), region = 85 }
  0x38   : > { %s399_s10 = scalar_lea.vmem %s1337_s4, %s1220_s7  ;;  %s814_s21 = sshll.u32 %s1381_s28, 2 }
  0x39   : > { %s816_s3 = sshll.u32 %s1381_s28, 3  ;;  %s378_s30 = scalar_lea.vmem %s1333_s0, %s814_s21 }
  0x3a   : > { %s1232_s25 = scalar_lea.vmem %s1334_s1, %s816_s3  ;;  %s1237_s14 = scalar_lea.vmem %s1335_s2, %s816_s3 }
  0x3c   : > { %vm408_vm0 = vcmask 7168   ;;  %v1072_v4 = vmov -inf   ;;  %v1073_v5 = vmov 0.0  }
  0x3d   : > { %409 = vst.msk [vmem:[#allocation2] sm:$0xff] %vm408_vm0, %v1072_v4  ;;  %410 = vst.msk [vmem:[#allocation2 + $0x8] sm:$0xff] %vm408_vm0, %v1072_v4 }
  0x3e   : > { %415 = vst.msk [vmem:[#allocation4] sm:$0xff] %vm408_vm0, %v1072_v4  ;;  %416 = vst.msk [vmem:[#allocation4 + $0x8] sm:$0xff] %vm408_vm0, %v1072_v4 }
  0x3f   : > { %412 = vst.msk [vmem:[#allocation3] sm:$0xff] %vm408_vm0, %v1073_v5  ;;  %413 = vst.msk [vmem:[#allocation3 + $0x8] sm:$0xff] %vm408_vm0, %v1073_v5 }
  0x40 PF: > { %v947_v6 = vld [vmem:[%s327_s20 + $0x8] sm:$0xff]   ;;  %v1074_v7 = vmov 0.0   ;;  %v948_v8 = vld [vmem:[%s327_s20] sm:$0xff]   ;;  %vm1075_vm1 = vmmov 0   ;;  %vm447_vm2 = vcmask 261120   ;;  %v1076_v10 = vmov 0  }
  0x41   : > { %838 = vmatprep.subr.bf16.mxu0 %v1074_v7  ;;  %842 = vmatprep.mubr.msk.bf16.mxu0 %vm1075_vm1, %v1074_v7  ;;  %v949_v9 = vld [vmem:[%s378_s30] sm:$0xff]   ;;  %vm535_vm3 = vcmask 7168   ;;  %v543_v22 = vlaneseq  ;;  %s825_s20 = sshll.u32 %s1054_s23, 7  ;;  %v541_v30 = vld [vmem:[%s1232_s25 + $0x8] sm:$0xff]  ;;  %p826_p6 = scmp.ne.s32.totalorder %s1054_s23, 2 }
  0x42   : > { %839 = vmatpush3.bf16.msra.mxu0 %v947_v6  ;;  %946 = vset.pattern.permute.xlu0 %v1076_v10  ;;  %v820_v11 = vld [vmem:[%s399_s10] ss:$0 sm:$0xff]  ;;  %v545_v28 = vstv %s825_s20 }
  0x43   : > { %840 = vmatprep.subr.bf16.mxu0 %v1074_v7  ;;  %945 = vset.pattern.permute.xlu1 %v1076_v10  ;;  %v540_v18 = vld [vmem:[%s1232_s25] sm:$0xff]  ;;  %v1250_v27 = vand.u32 127, %v543_v22 }
  0x44   : > { %v498_v19 = vld [vmem:[#allocation2] sm:$0xff]  ;;  %v499_v23 = vld [vmem:[#allocation2 + $0x8] sm:$0xff] }
  0x45   : > { %v546_v31 = vadd.s32 %v545_v28, %v1250_v27  ;;  %v562_v43 = vld [vmem:[#allocation4] sm:$0xff]  ;;  %v563_v59 = vld [vmem:[#allocation4 + $0x8] sm:$0xff] }
  0x46   : > { %841 = vmatpush3.bf16.msra.mxu0 %v948_v8  ;;  %v525_v50 = vld [vmem:[#allocation3] sm:$0xff]  ;;  %v526_v54 = vld [vmem:[#allocation3 + $0x8] sm:$0xff] }
  0x49   : > { %843 = vmatmul.mubr.msk.bf16.vlgmr.msra.gmra.mxu0 %vm447_vm2, %v949_v9 }
 0x109   : > { %v485_v12 = vpop.f32.mrf.mxu0 }
 0x10a   : > { %v486_v13 = vadd.f32 %v820_v11, %v485_v12 }
 0x10b   : > { %v844_v14 = vpop.f32.mrf.mxu0 }
 0x10c   : > { %492 = vmax.xlane.f32.xlu0 %v486_v13 }
 0x10d   : > { %v488_v15 = vpop.f32.mrf.mxu0 }
 0x10e   : > { %v489_v16 = vadd.f32 %v820_v11, %v488_v15 }
 0x10f   : > { %v845_v17 = vpop.f32.mrf.mxu0 }
 0x110   : > { %494 = vmax.xlane.f32.xlu0 %v489_v16 }
 0x126   : > { %548 = vperm.xlu0 %946, %v540_v18  }
 0x195   : > { %v493_v20 = vpop.xlane.xlu0 %492 }
 0x196   : > { %v500_v21 = vmax.f32 %v498_v19, %v493_v20 }
 0x198   : > { %v502_v24 = vsub.f32 %v498_v19, %v500_v21  ;;  %538 = vst.msk [vmem:[#allocation2] sm:$0xff] %vm535_vm3, %v500_v21  ;;  %510 = vperm.xlu1 %945, %v500_v21  }
 0x199   : > { %v495_v25 = vpop.xlane.xlu0 %494 }
 0x19a   : > { %v501_v26 = vmax.f32 %v499_v23, %v495_v25  ;;  %v504_v47 = vmul.f32 1.442695, %v502_v24 }
 0x19c   : > { %v503_v29 = vsub.f32 %v499_v23, %v501_v26  ;;  %539 = vst.msk [vmem:[#allocation2 + $0x8] sm:$0xff] %vm535_vm3, %v501_v26  ;;  %515 = vperm.xlu1 %945, %v501_v26  }
 0x19e   : > { %v506_v48 = vmul.f32 1.442695, %v503_v29 }
 0x1a0   : > { %551 = vperm.xlu1 %945, %v541_v30  }
 0x1a1   : > { %v549_v32 = vpop.permute.xlu0 %548 }
 0x1a2   : > { %vm553_vm4 = vcmp.eq.s32.totalorder %v546_v31, %v549_v32 }
 0x1a3   : > { %v555_v33 = vsel %vm553_vm4, %v486_v13, -inf }
 0x1a4   : > { %557 = vmax.xlane.f32.xlu0 %v555_v33 }
 0x213   : > { %v511_v34 = vpop.permute.xlu1 %510 }
 0x214   : > { %v518_v35 = vsub.f32 %v486_v13, %v511_v34 }
 0x216   : > { %v520_v36 = vmul.f32 1.442695, %v518_v35 }
 0x217   : > { %v516_v37 = vpop.permute.xlu1 %515 }
 0x218   : > { %950 = vpow2.f32 %v520_v36  ;;  %v519_v38 = vsub.f32 %v489_v16, %v516_v37 }
 0x21a   : > { %v522_v39 = vmul.f32 1.442695, %v519_v38 }
 0x21b   : > { %v552_v41 = vpop.permute.xlu1 %551 }
 0x21c   : > { %952 = vpow2.f32 %v522_v39  ;;  %vm554_vm5 = vcmp.eq.s32.totalorder %v546_v31, %v552_v41 }
 0x21d   : > { %v556_v45 = vsel %vm554_vm5, %v489_v16, -inf  ;;  %954 = vpow2.f32 %v504_v47 }
 0x21e   : > { %956 = vpow2.f32 %v506_v48 }
 0x225   : > { %v951_v40 = vpop.eup %950 }
 0x226   : > { %529 = vadd.xlane.f32.xlu1 %v951_v40 }
 0x229   : > { %v953_v42 = vpop.eup %952 }
 0x22a   : > { %531 = vadd.xlane.f32.xlu1 %v953_v42  ;;  %v955_v49 = vpop.eup %954 }
 0x22b   : > { %v527_v51 = vmul.f32 %v955_v49, %v525_v50  ;;  %v957_v52 = vpop.eup %956 }
 0x22c   : > { %v528_v56 = vmul.f32 %v957_v52, %v526_v54 }
 0x22d   : > { %v558_v44 = vpop.xlane.xlu0 %557 }
 0x22e   : > { %v564_v46 = vmax.f32 %v562_v43, %v558_v44  ;;  %559 = vmax.xlane.f32.xlu1 %v556_v45 }
 0x230   : > { %566 = vst.msk [vmem:[#allocation4] sm:$0xff] %vm535_vm3, %v564_v46 }
 0x2af   : > { %v530_v53 = vpop.xlane.xlu1 %529 }
 0x2b0   : > { %v533_v55 = vadd.f32 %v530_v53, %v527_v51 }
 0x2b2   : > { %536 = vst.msk [vmem:[#allocation3] sm:$0xff] %vm535_vm3, %v533_v55 }
 0x2b3   : > { %v532_v57 = vpop.xlane.xlu1 %531 }
 0x2b4   : > { %v534_v58 = vadd.f32 %v532_v57, %v528_v56 }
 0x2b6   : > { %537 = vst.msk [vmem:[#allocation3 + $0x8] sm:$0xff] %vm535_vm3, %v534_v58  ;;  %571 = sbr.rel (%p826_p6) target bundleno = 937 (0x3a9), region = 89 }
 0x2b7   : > { %v560_v60 = vpop.xlane.xlu1 %559 }
 0x2b8   : > { %v565_v61 = vmax.f32 %v563_v59, %v560_v60 }
 0x2ba   : > { %567 = vst.msk [vmem:[#allocation4 + $0x8] sm:$0xff] %vm535_vm3, %v565_v61 }
 0x2bb   : > { %v592_v62 = vld [vmem:[%s1237_s14] sm:$0xff]  ;;  %v593_v63 = vld [vmem:[%s1237_s14 + $0x8] sm:$0xff]  ;;  %v574_v0 = vld [vmem:[#allocation3] sm:$0xff]  ;;  %v1077_v2 = vmov 0.0   ;;  %vm640_vm10 = vcmp.eq.s32.totalorder %v1250_v27, 0  ;;  %vm643_vm11 = vcmp.eq.s32.totalorder %v1250_v27, 1 }
 0x2bc   : > { %vm594_vm6 = vcmp.gt.s32.totalorder %v592_v62, 0  ;;  %vm595_vm7 = vcmp.gt.s32.totalorder %v593_v63, 0  ;;  %958 = vlog2.f32 %v574_v0  ;;  %v572_v8 = vld [vmem:[#allocation2] sm:$0xff]  ;;  %v573_v9 = vld [vmem:[#allocation2 + $0x8] sm:$0xff]  ;;  %vm647_vm12 = vcmp.eq.s32.totalorder %v1250_v27, 2 }
 0x2bd   : > { %v575_v1 = vld [vmem:[#allocation3 + $0x8] sm:$0xff]  ;;  %v829_v3 = vsel %vm594_vm6, 1.0, %v1077_v2  ;;  %v830_v4 = vsel %vm595_vm7, 1.0, %v1077_v2  ;;  %v576_v10 = vld [vmem:[#allocation4] sm:$0xff] }
 0x2be   : > { %v628_v5 = vsel %vm535_vm3, %v829_v3, 0.0  ;;  %v629_v6 = vsel %vm535_vm3, %v830_v4, 0.0  ;;  %960 = vlog2.f32 %v575_v1  ;;  %vm586_vm8 = vcmp.ge.f32.partialorder %v576_v10, %v572_v8 }
 0x2bf   : > { %v630_v7 = vadd.f32 %v629_v6, %v628_v5  ;;  %v827_v17 = vsel %vm586_vm8, 1.0, %v1077_v2 }
 0x2c0   : > { %v610_v22 = vsel %vm594_vm6, %v827_v17, 0.0 }
 0x2c1   : > { %631 = vadd.xlane.f32.xlu1 %v630_v7  ;;  %v577_v11 = vld [vmem:[#allocation4 + $0x8] sm:$0xff]  ;;  %v612_v29 = vsel %vm535_vm3, %v610_v22, 0.0 }
 0x2c2   : > { %vm587_vm9 = vcmp.ge.f32.partialorder %v577_v11, %v573_v9 }
 0x2c3   : > { %v828_v18 = vsel %vm587_vm9, 1.0, %v1077_v2 }
 0x2c4   : > { %v611_v23 = vsel %vm595_vm7, %v828_v18, 0.0 }
 0x2c5   : > { %v613_v30 = vsel %vm535_vm3, %v611_v23, 0.0 }
 0x2c6   : > { %v614_v32 = vadd.f32 %v613_v30, %v612_v29 }
 0x2c9   : > { %v959_v12 = vpop.eup %958 }
 0x2ca   : > { %v579_v14 = vmul.f32 0.6931472, %v959_v12 }
 0x2cb   : > { %v961_v13 = vpop.eup %960 }
 0x2cc   : > { %v581_v15 = vmul.f32 0.6931472, %v961_v13  ;;  %v582_v16 = vadd.f32 %v579_v14, %v572_v8 }
 0x2ce   : > { %v583_v19 = vadd.f32 %v581_v15, %v573_v9  ;;  %v584_v20 = vsub.f32 %v582_v16, %v576_v10 }
 0x2d0   : > { %v585_v21 = vsub.f32 %v583_v19, %v577_v11  ;;  %v596_v24 = vsel %vm594_vm6, %v584_v20, 0.0 }
 0x2d1   : > { %v598_v26 = vsel %vm535_vm3, %v596_v24, 0.0 }
 0x2d2   : > { %v597_v25 = vsel %vm595_vm7, %v585_v21, 0.0 }
 0x2d3   : > { %v599_v28 = vsel %vm535_vm3, %v597_v25, 0.0 }
 0x2d4   : > { %v600_v31 = vadd.f32 %v599_v28, %v598_v26 }
 0x2d6   : > { %601 = vadd.xlane.f32.xlu0 %v600_v31 }
 0x2da   : > { %615 = vadd.xlane.f32.xlu0 %v614_v32 }
 0x34a   : > { %v632_v33 = vpop.xlane.xlu1 %631 }
 0x34b   : > { %v633_v34 = vrot.slane %v632_v33, 4 }
 0x34d   : > { %v634_v35 = vadd.f32 %v633_v34, %v632_v33 }
 0x34f   : > { %v635_v39 = vrot.slane %v634_v35, 2 }
 0x351   : > { %v636_v45 = vadd.f32 %v635_v39, %v634_v35 }
 0x353   : > { %v637_v50 = vrot.slane %v636_v45, 1 }
 0x355   : > { %v638_v53 = vadd.f32 %v637_v50, %v636_v45 }
 0x35f   : > { %v602_v36 = vpop.xlane.xlu0 %601 }
 0x360   : > { %v603_v37 = vrot.slane %v602_v36, 4 }
 0x362   : > { %v604_v38 = vadd.f32 %v603_v37, %v602_v36 }
 0x363   : > { %v616_v40 = vpop.xlane.xlu0 %615 }
 0x364   : > { %v605_v41 = vrot.slane %v604_v38, 2  ;;  %v617_v42 = vrot.slane %v616_v40, 4 }
 0x366   : > { %v618_v43 = vadd.f32 %v617_v42, %v616_v40  ;;  %v606_v44 = vadd.f32 %v605_v41, %v604_v38 }
 0x368   : > { %v619_v46 = vrot.slane %v618_v43, 2  ;;  %v607_v47 = vrot.slane %v606_v44, 1 }
 0x36a   : > { %v620_v48 = vadd.f32 %v619_v46, %v618_v43  ;;  %v608_v49 = vadd.f32 %v607_v47, %v606_v44 }
 0x36c   : > { %846 = vpush %v608_v49  ;;  %v621_v51 = vrot.slane %v620_v48, 1 }
 0x36e   : > { %v622_v52 = vadd.f32 %v621_v51, %v620_v48 }
 0x370   : > { %848 = vpush %v622_v52 }
 0x371   : > { %850 = vpush %v638_v53 }
 0x39d   : > { %s847_s23 = spop %846 }
 0x39e   : > { %v641_v54 = vstv %s847_s23 }
 0x39f   : > { %v642_v56 = vsel %vm640_vm10, %v641_v54, 0.0 }
 0x3a1   : > { %s849_s25 = spop %848 }
 0x3a2   : > { %v644_v55 = vstv %s849_s25  ;;  %s851_s26 = spop %850 }
 0x3a3   : > { %v645_v57 = vsel %vm643_vm11, %v644_v55, 0.0  ;;  %v648_v58 = vstv %s851_s26 }
 0x3a4   : > { %v646_v59 = vadd.f32 %v645_v57, %v642_v56  ;;  %v649_v60 = vsel %vm647_vm12, %v648_v58, 0.0 }
 0x3a6   : > { %v650_v61 = vadd.f32 %v649_v60, %v646_v59 }
 0x3a8   : > { %651 = vst [vmem:[%s372_s15] sm:$0xff] %v650_v61 }
 0x3a9 PF: > { %s832_s30 = sshll.u32 %s1058_s24, 7  ;;  %s667_s12 = sshll.u32 %s372_s15, 4  ;;  %s668_s12 = int_to_ptr.vmem [resolvable:$true] %s667_s12 }
 0x3aa   : > { %s665_s14 = scalar_lea.hbm %s1338_s5, %s832_s30  ;;  %s1361_s16 = sand.u32 1, %s1038_s19  }
 0x3ab   : > { %s653_s28 = scalar_lea.sflag [#allocation7], %s1361_s16  ;;  %s962_s7 = scalar_lea.vmem %s668_s12, 128 }
 0x3ac   : > { %p963_p7 = scmp.ne.s32.totalorder %s668_s12, %s962_s7  ;;  %s1078_s8 = smov [#allocation6]  }
 0x3ad   : > { %s966_s29 = sshll.u32 %s1078_s8, 4  ;;  %s967_s29 = int_to_ptr.vmem [resolvable:$false] %s966_s29 }
 0x3ae   : > { %p964_p8 = pnand %p963_p7, %p1188_p10  ;;  %s968_s10 = scalar_lea.vmem %s967_s29, 256 }
 0x3af   : > { %p969_p11 = scmp.lt.s32.totalorder %s668_s12, %s967_s29  ;;  %p970_p13 = scmp.lt.s32.totalorder %s968_s10, %s962_s7 }
 0x3b0   : > { %p965_p9 = pneg %p964_p8 }
 0x3b1   : > { %p971_p0 = por %p970_p13, %p969_p11 }
 0x3b3   : > { %p972_p1 = pnand %p971_p0, %p965_p9 }
 0x3b5   : > { %975 = shalt.err (!%p972_p1)
}
 0x3b6   : > { %s976_s24 = scalar_lea.hbm %s665_s14, 128  ;;  %s980_s21 = scalar_lea.hbm %s1338_s5, 256 }
 0x3b7   : > { %p977_p2 = scmp.ne.s32.totalorder %s665_s14, %s976_s24  ;;  %p981_p5 = scmp.lt.s32.totalorder %s665_s14, %s1338_s5 }
 0x3b8   : > { %p982_p6 = scmp.lt.s32.totalorder %s980_s21, %s976_s24 }
 0x3b9   : > { %p978_p3 = pnand %p977_p2, %p1188_p10 }
 0x3ba   : > { %p983_p7 = por %p982_p6, %p981_p5 }
 0x3bb   : > { %p979_p4 = pneg %p978_p3 }
 0x3bd   : > { %p984_p8 = pnand %p983_p7, %p979_p4 }
 0x3bf   : > { %987 = shalt.err (!%p984_p8)
}
 0x3c0   : > { %852 = dma.vmem_to_hbm [thread:$0]  (%p1188_p10), %s668_s12, 128, %s665_s14, %s653_s28  }
 0x3c1 PF: > { %p858_p9 = scmp.ge.s32.totalorder %s1070_s27, 2  ;;  %s679_s20 = sand.u32 1, %s1034_s18  }
 0x3c2   : > { %s680_s23 = scalar_lea.sflag [#allocation7], %s679_s20 }
 0x3c3   : > { %p855_p11 = pnand %p858_p9, %p1195_p12 }
 0x3c5   : > { %p856_p13 = pneg %p855_p11 }
 0x3c7   : > { %1029 = dma.done.wait (%p856_p13), %s680_s23, 128  }
 0x3c8   : > { %1031 = vsyncadd (%p856_p13), %s680_s23, 4294967168  ;;  %s18_s27 = sadd.s32 1, %s1070_s27   ;;  %s1363_s25 = sld [smem:[#allocation9_spill]] }
 0x3c9   : > { %p15_p0 = scmp.ge.s32.totalorder %s18_s27, 8   ;;  %s1364_s20 = sld [smem:[#allocation16_spill]] }
 0x3ca   : > { %s1365_s21 = sld [smem:[#allocation10_spill]]  ;;  %s1371_s18 = smov %s1038_s19 }
 0x3cb   : > { %s1366_s22 = sld [smem:[#allocation15_spill]] }
 0x3cc   : > { %s1367_s23 = sld [smem:[#allocation11_spill]] }
 0x3cd   : > { %s1368_s24 = sld [smem:[#allocation12_spill]] }
 0x3ce   : > { %s1369_s13 = sld [smem:[#allocation13_spill]]  ;;  %s1372_s19 = smov %s1363_s25 }
 0x3cf   : > { %s1370_s26 = sld [smem:[#allocation14_spill]] }
 0x3d0   :  { %17 = sbr.rel (!%p15_p0) target bundleno = 8 (0x8), region = 147 }
 0x3d4   : > { %s1373_s25 = smov %s1369_s13 }
 0x3d5   :  { %685 = vsyncpa [#allocation7], 1 }
 0x3d6   :  { %687 = vsyncpa [#allocation7 + $0x1], 1 }

</bundles_post_ra>
